<compile_context>
chip_gen: v5e
topology: v5e:2x2
jax: 0.10.0
libtpu: 0.0.40
codegen_flags: <defaults>
</compile_context>

<pallas_src>
import functools

import jax
import jax.numpy as jnp
from jax.experimental import pallas as pl
from jax.experimental.pallas import tpu as pltpu


# ----------------------------------------------------------------------------
# 1) Stand-alone Masklayer kernel for NCHW inputs (lane-dense, big tiles).
# ----------------------------------------------------------------------------
def _mask_kernel(x_ref, o_ref, *, esp):
    # x_ref tile: (B_t, C, S_t, 128).  C is a leading axis, so the |x| channel
    # reduction is plain VPU vreg adds across vregs (no cross-sublane XLU work).
    s = jnp.sum(jnp.abs(x_ref[...]).astype(jnp.float32), axis=1, keepdims=True)
    o_ref[...] = (s > esp).astype(o_ref.dtype)          # (B_t, 1, S_t, 128)


def _plan_mask_tiling(B, C, HW, *, target_step_bytes=8 * 1024 * 1024):
    """Pick (batch_tile, lane_groups_per_step, padded_HW).

    Targets ~8 MiB of input bytes per grid step (hides the ~0.35 us fixed
    per-step overhead on v5e/v6e/v7x) while keeping the double-buffered VMEM
    footprint well under v7x's 64 MiB physical VMEM.
    """
    groups = pl.cdiv(HW, 128)                 # 128-lane groups per batch row
    bytes_per_group = C * 128 * 4             # f32 input bytes per group
    row_bytes = groups * bytes_per_group

    if row_bytes <= target_step_bytes:
        # A whole batch row fits in one step -> block several rows per step.
        s_t = groups
        hw_pad = groups * 128
        b_t = max(1, min(B, target_step_bytes // row_bytes))
        while B % b_t:
            b_t -= 1
        # v7x has 2 TensorCores: keep >= 2 grid steps when possible.
        if b_t == B and B > 1:
            b_t = B // 2
            while B % b_t:
                b_t -= 1
    else:
        # Tile the spatial axis; S_t a multiple of 8 keeps full-vreg tiles.
        # TODO(synk): for very large C, also tile the channel axis with an
        # accumulator instead of loading every channel per step.
        s_t = max(8, (target_step_bytes // bytes_per_group) // 8 * 8)
        hw_pad = pl.cdiv(groups, s_t) * s_t * 128
        b_t = 1
    return b_t, s_t, hw_pad


def masklayer(x: jax.Array, esp: float = 1e-06) -> jax.Array:
    """x: (B, C, H, W) -> mask: (B, H, W) float32 (PyTorch Masklayer on NCHW)."""
    B, C, H, W = x.shape
    HW = H * W
    b_t, s_t, hw_pad = _plan_mask_tiling(B, C, HW)
    groups = hw_pad // 128

    xf = x.reshape(B, C, HW)
    if hw_pad != HW:                 # zero padding: |0| sum <= esp -> mask 0, sliced off
        xf = jnp.pad(xf, ((0, 0), (0, 0), (0, hw_pad - HW)))
    xf = xf.reshape(B, C, groups, 128)   # (sublane, lane) = (groups, 128): lane-dense

    grid = (B // b_t, groups // s_t)
    out = pl.pallas_call(
        functools.partial(_mask_kernel, esp=esp),
        out_shape=jax.ShapeDtypeStruct((B, 1, groups, 128), jnp.float32),
        grid=grid,
        in_specs=[pl.BlockSpec((b_t, C, s_t, 128), lambda b, j: (b, 0, j, 0))],
        out_specs=pl.BlockSpec((b_t, 1, s_t, 128), lambda b, j: (b, 0, j, 0)),
        compiler_params=pltpu.CompilerParams(
            # Both grid axes are independent -> shard across TensorCores.
            dimension_semantics=("parallel", "parallel"),
            # 2x ~8 MiB double-buffered input + output buffers fit easily;
            # 48 MiB is safe on every generation (v7x physical VMEM is 64 MiB).
            vmem_limit_bytes=48 * 1024 * 1024,
        ),
    )(xf)
    return out.reshape(B, hw_pad)[:, :HW].reshape(B, H, W)


# ----------------------------------------------------------------------------
# 2) Fused, batched MLP_self forward kernel.
# ----------------------------------------------------------------------------
def _mlp_self_kernel(x_ref, emb_ref, w1_ref, ln1_ref, w2_ref, ln2_ref, w3b_ref,
                     o_ref, hflat_ref, *, esp, ln_eps):
    x = x_ref[0].astype(jnp.float32)                          # (S, num_i)
    S, _ = x.shape
    num_h = w1_ref.shape[1]

    # ---- Masklayer + Embedding(2, num_i), fused as a select ------------------
    # emb_ref row 0 = emb[0], row 1 = emb[1] - emb[0] (packed in the wrapper).
    mask = (jnp.sum(jnp.abs(x), axis=1, keepdims=True) > esp).astype(jnp.float32)
    combined = x + emb_ref[0:1, :] + mask * emb_ref[1:2, :]   # (S, num_i)

    # ---- global_mlp: Linear -> LayerNorm -> Tanh -----------------------------
    h = jnp.dot(combined, w1_ref[...], preferred_element_type=jnp.float32)
    h = h + ln1_ref[0:1, :]                                   # + b1
    mu = jnp.mean(h, axis=-1, keepdims=True)
    var = jnp.mean(h * h, axis=-1, keepdims=True) - mu * mu   # E[x^2] - mu^2
    h = (h - mu) * jax.lax.rsqrt(var + ln_eps)
    h = jnp.tanh(h * ln1_ref[1:2, :] + ln1_ref[2:3, :])       # (S, num_h)

    # ---- regressor ------------------------------------------------------------
    # fused.view(-1) @ W2 as ONE MXU matmul: flatten (S, num_h) -> (1, S*num_h)
    # with S static stores into a small VMEM scratch (no in-kernel reshape,
    # no serial chain of seven M=1 matmuls).
    for si in range(S):                                       # S == 7, static
        hflat_ref[:, pl.ds(si * num_h, num_h)] = h[si:si + 1, :]
    z = jnp.dot(hflat_ref[...], w2_ref[...], preferred_element_type=jnp.float32)
    z = z + ln2_ref[0:1, :]                                   # (1, 112)
    mu2 = jnp.mean(z, axis=-1, keepdims=True)
    var2 = jnp.mean(z * z, axis=-1, keepdims=True) - mu2 * mu2
    z = (z - mu2) * jax.lax.rsqrt(var2 + ln_eps)
    z = jnp.tanh(z * ln2_ref[1:2, :] + ln2_ref[2:3, :])       # (1, 112)

    # final Linear: bias folded into the last row of w3b.
    F = w3b_ref.shape[0] - 1
    out = jnp.dot(z, w3b_ref[0:F, :], preferred_element_type=jnp.float32)
    o_ref[0] = (out + w3b_ref[F:F + 1, :]).astype(o_ref.dtype)  # (1, num_o)


def mlp_self_forward_batched(x: jax.Array, params: dict,
                             esp: float = 1e-06, ln_eps: float = 1e-05) -> jax.Array:
    """Batched fused MLP_self forward.  x: (N, 7, num_i) -> (N, num_o)."""
    N, S, num_i = x.shape
    num_h = params["w1"].shape[1]
    num_o = params["w3"].shape[1]

    # Pack operands (13 -> 7) so the kernel issues far fewer tiny DMAs.
    emb = params["emb"].astype(jnp.float32)
    emb_p = jnp.stack([emb[0], emb[1] - emb[0]], axis=0)                   # (2, num_i)
    ln1 = jnp.stack([params["b1"], params["g1"], params["be1"]], axis=0)   # (3, num_h)
    ln2 = jnp.stack([params["b2"], params["g2"], params["be2"]], axis=0)   # (3, 112)
    w3b = jnp.concatenate([params["w3"], params["b3"][None, :]], axis=0)   # (113, num_o)

    def resident(arr):  # full-array block, constant index -> DMA'd once, VMEM-resident
        return pl.BlockSpec(arr.shape, lambda n, _nd=arr.ndim: (0,) * _nd)

    out = pl.pallas_call(
        functools.partial(_mlp_self_kernel, esp=esp, ln_eps=ln_eps),
        out_shape=jax.ShapeDtypeStruct((N, 1, num_o), jnp.float32),
        grid=(N,),
        in_specs=[
            pl.BlockSpec((1, S, num_i), lambda n: (n, 0, 0)),
            resident(emb_p), resident(params["w1"]), resident(ln1),
            resident(params["w2"]), resident(ln2), resident(w3b),
        ],
        out_specs=pl.BlockSpec((1, 1, num_o), lambda n: (n, 0, 0)),
        scratch_shapes=[pltpu.VMEM((1, S * num_h), jnp.float32)],
        compiler_params=pltpu.CompilerParams(
            dimension_semantics=("parallel",),   # batch axis across v7x TCs
        ),
    )(x, emb_p, params["w1"], ln1, params["w2"], ln2, w3b)
    return out.reshape(N, num_o)


def mlp_self_forward(x: jax.Array, params: dict,
                     esp: float = 1e-06, ln_eps: float = 1e-05) -> jax.Array:
    """Single-sample MLP_self forward (PyTorch semantics).  x: (7, num_i) -> (num_o,)."""
    return mlp_self_forward_batched(x[None], params, esp, ln_eps)[0]


if __name__ == "__main__":
    key = jax.random.PRNGKey(0)

    # --- Stand-alone Masklayer check (NCHW input) ------------------------------
    B, C, H, W = 2, 4, 16, 16
    key, k = jax.random.split(key)
    xm = jax.random.normal(k, (B, C, H, W), dtype=jnp.float32)
    xm = xm.at[:, :, 0, 0].set(0.0)           # force a 0 entry in the mask
    m = jax.block_until_ready(masklayer(xm))
    m_ref = (jnp.sum(jnp.abs(xm), axis=1) > 1e-06).astype(jnp.float32)
    assert m.shape == (B, H, W) and m.dtype == jnp.float32
    assert bool(jnp.all(m == m_ref))

    # --- Full MLP_self forward --------------------------------------------------
    S, num_i, num_h, num_o = 7, 32, 32, 8     # num_heads is unused by the module
    keys = jax.random.split(key, 9)
    x1 = jax.random.normal(keys[0], (S, num_i), dtype=jnp.float32)
    x1 = x1.at[0, :].set(0.0)                 # row 0 -> mask 0 -> embedding row 0

    params = {
        "emb": jax.random.normal(keys[1], (2, num_i), dtype=jnp.float32),
        "w1": jax.random.normal(keys[2], (num_i, num_h), dtype=jnp.float32) / jnp.sqrt(num_i),
        "b1": jax.random.normal(keys[3], (num_h,), dtype=jnp.float32) * 0.1,
        "g1": jnp.ones((num_h,), jnp.float32),
        "be1": jnp.zeros((num_h,), jnp.float32),
        "w2": jax.random.normal(keys[4], (S * num_h, 112), dtype=jnp.float32) / jnp.sqrt(S * num_h),
        "b2": jax.random.normal(keys[5], (112,), dtype=jnp.float32) * 0.1,
        "g2": jnp.ones((112,), jnp.float32),
        "be2": jnp.zeros((112,), jnp.float32),
        "w3": jax.random.normal(keys[6], (112, num_o), dtype=jnp.float32) / jnp.sqrt(112.0),
        "b3": jax.random.normal(keys[7], (num_o,), dtype=jnp.float32) * 0.1,
    }

    # Plain-JAX reference mirroring the PyTorch forward.
    def ref_forward(x, p, esp=1e-06, eps=1e-05):
        mask = (jnp.sum(jnp.abs(x), axis=1) > esp).astype(jnp.float32)    # (S,)
        mask_feat = p["emb"][mask.astype(jnp.int32)]                      # (S, num_i)
        combined = x + mask_feat
        h = combined @ p["w1"] + p["b1"]
        mu = h.mean(-1, keepdims=True)
        var = ((h - mu) ** 2).mean(-1, keepdims=True)
        h = jnp.tanh((h - mu) / jnp.sqrt(var + eps) * p["g1"] + p["be1"])
        flat = h.reshape(-1)
        z = flat @ p["w2"] + p["b2"]
        mu2 = z.mean()
        var2 = ((z - mu2) ** 2).mean()
        z = jnp.tanh((z - mu2) / jnp.sqrt(var2 + eps) * p["g2"] + p["be2"])
        return z @ p["w3"] + p["b3"]

    out1 = jax.block_until_ready(mlp_self_forward(x1, params))
    ref1 = ref_forward(x1, params)
    assert out1.shape == (num_o,) and out1.dtype == jnp.float32
    assert bool(jnp.allclose(out1, ref1, rtol=1e-2, atol=1e-2)), (out1, ref1)

    # Batched path: grid over N samples with VMEM-resident packed weights.
    N = 4
    xb = jax.random.normal(keys[8], (N, S, num_i), dtype=jnp.float32)
    xb = xb.at[0, 0, :].set(0.0)              # exercise both embedding rows
    outb = jax.block_until_ready(mlp_self_forward_batched(xb, params))
    refb = jax.vmap(lambda xi: ref_forward(xi, params))(xb)
    assert outb.shape == (N, num_o)
    assert bool(jnp.allclose(outb, refb, rtol=1e-2, atol=1e-2)), (outb, refb)

    print("KERNEL_OK")
</pallas_src>

<mosaic_0001>
module attributes {stable_mosaic.version = 11 : i64} {
  func.func @_mask_kernel(%arg0: i32, %arg1: i32, %arg2: memref<1x4x2x128xf32, #tpu.memory_space<vmem>>, %arg3: memref<1x1x2x128xf32, #tpu.memory_space<vmem>>) attributes {dimension_semantics = [#tpu.dimension_semantics<parallel>, #tpu.dimension_semantics<parallel>], iteration_bounds = array<i64: 2, 1>, scalar_prefetch = 0 : i64, scratch_operands = 0 : i64, tpu.core_type = #tpu.core_type<tc>, window_params = [{transform_indices = @transform_0, window_bounds = array<i64: 1, 4, 2, 128>}, {transform_indices = @transform_1, window_bounds = array<i64: 1, 1, 2, 128>}]} {
    %c0 = arith.constant 0 : index
    %c0_0 = arith.constant 0 : index
    %c0_1 = arith.constant 0 : index
    %c0_2 = arith.constant 0 : index
    %0 = vector.load %arg2[%c0, %c0_0, %c0_1, %c0_2] : memref<1x4x2x128xf32, #tpu.memory_space<vmem>>, vector<1x4x2x128xf32>
    %1 = math.absf %0 : vector<1x4x2x128xf32>
    %cst = arith.constant dense<0.000000e+00> : vector<1x2x128xf32>
    %2 = vector.multi_reduction <add>, %1, %cst [1] : vector<1x4x2x128xf32> to vector<1x2x128xf32>
    %3 = vector.shape_cast %2 : vector<1x2x128xf32> to vector<1x1x2x128xf32>
    %cst_3 = arith.constant 9.99999997E-7 : f32
    %4 = vector.broadcast %cst_3 : f32 to vector<1x1x2x128xf32>
    %5 = arith.cmpf ogt, %3, %4 : vector<1x1x2x128xf32>
    %6 = arith.extui %5 : vector<1x1x2x128xi1> to vector<1x1x2x128xi32>
    %7 = arith.sitofp %6 : vector<1x1x2x128xi32> to vector<1x1x2x128xf32>
    %c0_4 = arith.constant 0 : index
    %c0_5 = arith.constant 0 : index
    %c0_6 = arith.constant 0 : index
    %c0_7 = arith.constant 0 : index
    %8 = vector.load %arg3[%c0_4, %c0_5, %c0_6, %c0_7] : memref<1x1x2x128xf32, #tpu.memory_space<vmem>>, vector<1x1x2x128xf32>
    tpu.vector_store %arg3[%c0_4, %c0_5, %c0_6, %c0_7], %7 {strides = array<i32>} : memref<1x1x2x128xf32, #tpu.memory_space<vmem>>, vector<1x1x2x128xf32>,
    return
  }
  func.func @transform_0(%arg0: i32, %arg1: i32) -> (i32, i32, i32, i32) {
    %c0_i32 = arith.constant 0 : i32
    %c0_i32_0 = arith.constant 0 : i32
    %c0_i32_1 = arith.constant 0 : i32
    return %arg0, %c0_i32, %arg1, %c0_i32_0 : i32, i32, i32, i32
  }
  func.func @transform_1(%arg0: i32, %arg1: i32) -> (i32, i32, i32, i32) {
    %c0_i32 = arith.constant 0 : i32
    %c0_i32_0 = arith.constant 0 : i32
    %c0_i32_1 = arith.constant 0 : i32
    return %arg0, %c0_i32, %arg1, %c0_i32_0 : i32, i32, i32, i32
  }
}

</mosaic_0001>

<bundles_post_ra>
// kernel: tpu_custom_call.1
= control target key start
LH: loop header
LB: loop body
LE: loop exit
PB: predicated region body
PF: predicated region fallthrough
CT: control target
= control target key end

     0   :  { %6 = vsyncpa [#allocation3], 0  ;;  %s601_s0 = inlined_call_operand.hbm [shape: f32[2,4,2,128], index: 0, kind: input, shape index: {}]   ;;  %s602_s1 = inlined_call_operand.hbm [shape: f32[2,1,2,128], index: 1, kind: output, shape index: {}]  }
   0x1   :  { %8 = vsyncpa [#allocation3 + $0x1], 0 }
   0x2   :  { %9 = vsyncpa [#allocation4], 0 }
   0x3   :  { %11 = vsyncpa [#allocation4 + $0x1], 0  ;;  %s480_s6 = smov 0   ;;  %s482_s7 = smov 0  }
   0x4   :  { %s484_s8 = smov 0   ;;  %s486_s9 = smov 0  }
   0x5   :  { %s488_s10 = smov 0   ;;  %s490_s11 = smov 0  }
   0x6 LB: > { %s272_s12 = sadd.s32 4294967295, %s465_s11   ;;  %s273_s13 = sadd.s32 4294967294, %s465_s11   ;;  %s465_s11 = sphi %s490_s11, %s17_s11   ;;  %s461_s10 = sphi %s488_s10, %s611_s10   ;;  %s457_s9 = sphi %s486_s9, %s610_s9   ;;  %s453_s8 = sphi %s484_s8, %s609_s8   ;;  %s449_s7 = sphi %s482_s7, %s608_s7   ;;  %s445_s6 = sphi %s480_s6, %s607_s6  }
   0x7   : > { %s29_s14 = sadd.s32 1, %s461_s10  ;;  %s38_s15 = sadd.s32 1, %s453_s8 }
   0x8   : > { %p31_p0 = scmp.ge.s32.totalorder %s29_s14, 2  ;;  %p45_p1 = scmp.ne.s32.totalorder %s453_s8, %s449_s7 }
   0x9   : > { %p46_p2 = scmp.eq.s32.totalorder %s465_s11, 0  ;;  %p51_p3 = scmp.ne.s32.totalorder %s449_s7, %s445_s6 }
   0xa   : > { %s613_s14 = smov (%p31_p0, %s29_s14), 0  ;;  %p52_p5 = scmp.eq.s32.totalorder %s272_s12, 0 }
   0xb   : > { %p521_p4 = por %p46_p2, %p45_p1  ;;  %s33_s17 = ssub.s32 %s461_s10, %s613_s14 }
   0xc   : > { %p77_p6 = scmp.eq.s32.totalorder %s272_s12, 1  ;;  %p36_p7 = scmp.eq.s32.totalorder %s33_s17, 0 }
   0xd   : > { %p527_p8 = por %p52_p5, %p51_p3  ;;  %p83_p10 = scmp.eq.s32.totalorder %s273_s13, 1 }
   0xe   : > { %p531_p9 = por %p77_p6, %p45_p1  ;;  %p275_p12 = scmp.ge.s32.totalorder %s465_s11, 2 }
   0xf   : > { %s536_s20 = scalar_select %p36_p7, %s453_s8, %s38_s15  }
  0x10   : > { %p538_p11 = por %p83_p10, %p51_p3  ;;  %p300_p13 = scmp.lt.s32.totalorder %s465_s11, 2 }
  0x11   : > { %s103_s22 = sand.u32 1, %s453_s8   ;;  %s287_s24 = sshll.u32 %s461_s10, 3 }
  0x12   : > { %s276_s23 = sshll.u32 %s103_s22, 3  ;;  %s113_s27 = scalar_lea.hbm %s601_s0, %s287_s24 }
  0x13   : > { %s107_s28 = scalar_lea.vmem [#allocation2], %s276_s23  ;;  %s114_s30 = sshll.u32 %s113_s27, 4  ;;  %s115_s30 = int_to_ptr.hbm [resolvable:$true] %s114_s30 }
  0x14   : > { %s116_s29 = sshll.u32 %s107_s28, 4  ;;  %p293_p0 = pnand %p300_p13, %p521_p4  ;;  %s117_s29 = int_to_ptr.vmem [resolvable:$true] %s116_s29 }
  0x15   : > { %p279_p1 = scmp.ge.s32.totalorder %s465_s11, 1  ;;  %s104_s2 = scalar_lea.sflag [#allocation3], %s103_s22 }
  0x16   : > { %s467_s3 = smov 32   ;;  %s468_s4 = smov 2  }
  0x17   : > { %295 = dma.hbm_to_vmem [thread:$0]  (!%p293_p0), %s115_s30, 128, %s117_s29, %s104_s2, %s467_s3, %s467_s3, %s468_s4  }
  0x18   : > { %p124_p2 = scmp.lt.s32.totalorder %s465_s11, 3 }
  0x1a   : > { %p125_p3 = pnand %p279_p1, %p124_p2 }
  0x1b   : > { %s554_s5 = sand.u32 (!%p125_p3), 1, %s449_s7  }
  0x1c   : > { %128 = sbr.rel (%p125_p3) target bundleno = 51 (0x33), region = 24  ;;  %s280_s12 = sshll.u32 (!%p125_p3), %s554_s5, 3 }
  0x1d   : > { %s131_s13 = scalar_lea.sflag (!%p125_p3), [#allocation3], %s554_s5  ;;  %s134_s15 = scalar_lea.vmem (!%p125_p3), [#allocation2], %s280_s12 }
  0x21   : > { %436 = dma.done.wait (%p527_p8), %s131_s13, 128  }
  0x22   : > { %438 = vsyncadd (%p527_p8), %s131_s13, 4294967168  ;;  %s281_s16 = sshll.u32 %s554_s5, 1  ;;  %vm162_vm0 = vcmask 1041408   ;;  %s284_s17 = sshll.u32 %s457_s9, 1  ;;  %v154_v0 = vld [vmem:[%s134_s15] sm:$0x3] }
  0x23   : > { %v155_v1 = vld [vmem:[%s134_s15 + $0x2] sm:$0x3]  ;;  %v156_v2 = vld [vmem:[%s134_s15 + $0x4] sm:$0x3]  ;;  %v157_v3 = vld [vmem:[%s134_s15 + $0x6] sm:$0x3]  ;;  %s186_s23 = scalar_lea.hbm %s602_s1, %s284_s17 }
  0x24   : > { %v158_v4 = vand.u32 2147483647, %v154_v0  ;;  %v159_v5 = vand.u32 2147483647, %v155_v1  ;;  %v160_v6 = vand.u32 2147483647, %v156_v2 }
  0x25   : > { %v161_v7 = vand.u32 2147483647, %v157_v3  ;;  %s153_s9 = scalar_lea.vmem [#allocation5], %s281_s16  ;;  %s190_s25 = sshll.u32 %s186_s23, 4  ;;  %v469_v15 = vmov 0.0   ;;  %s191_s25 = int_to_ptr.hbm [resolvable:$true] %s190_s25 }
  0x26   : > { %v163_v8 = vsel %vm162_vm0, %v158_v4, 0.0  ;;  %v164_v9 = vsel %vm162_vm0, %v159_v5, 0.0  ;;  %v166_v11 = vsel %vm162_vm0, %v160_v6, 0.0  ;;  %s188_s24 = sshll.u32 %s153_s9, 4  ;;  %s175_s26 = scalar_lea.sflag [#allocation4], %s554_s5  ;;  %s189_s24 = int_to_ptr.vmem [resolvable:$true] %s188_s24 }
  0x27   : > { %v165_v10 = vadd.f32 %v164_v9, %v163_v8  ;;  %v168_v12 = vsel %vm162_vm0, %v161_v7, 0.0  ;;  %s397_s27 = sshra.s32 %s191_s25, 4  ;;  %s403_s2 = scalar_lea.hbm %s602_s1, 4  ;;  %s398_s27 = int_to_ptr.hbm [resolvable:$true] %s397_s27 }
  0x28   : > { %s399_s28 = scalar_lea.hbm %s398_s27, 2  ;;  %p404_p7 = scmp.lt.s32.totalorder %s398_s27, %s602_s1 }
  0x29   : > { %v167_v13 = vadd.f32 %v166_v11, %v165_v10  ;;  %p400_p4 = scmp.ne.s32.totalorder %s398_s27, %s399_s28  ;;  %p405_p8 = scmp.lt.s32.totalorder %s403_s2, %s399_s28 }
  0x2b   : > { %v169_v14 = vadd.f32 %v168_v12, %v167_v13  ;;  %p401_p5 = pnand %p400_p4, %p531_p9  ;;  %p406_p10 = por %p405_p8, %p404_p7 }
  0x2d   : > { %vm170_vm1 = vcmp.gt.f32.partialorder %v169_v14, 1e-06  ;;  %p402_p6 = pneg %p401_p5 }
  0x2e   : > { %v282_v16 = vsel %vm170_vm1, 1.0, %v469_v15 }
  0x2f   : > { %173 = vst [vmem:[%s153_s9] sm:$0x3] %v282_v16  ;;  %p407_p13 = pnand %p406_p10, %p402_p6 }
  0x31   : > { %410 = shalt.err (!%p407_p13)
}
  0x32   : > { %290 = dma.vmem_to_hbm [thread:$0]  (%p531_p9), %s189_s24, 32, %s191_s25, %s175_s26  }
  0x33 PF: > { %s202_s5 = sand.u32 1, %s445_s6   ;;  %p297_p0 = pnand %p275_p12, %p538_p11 }
  0x34   : > { %s203_s12 = scalar_lea.sflag [#allocation4], %s202_s5 }
  0x35   : > { %p298_p1 = pneg %p297_p0 }
  0x37   : > { %440 = dma.done.wait (%p298_p1), %s203_s12, 32  }
  0x38   : > { %442 = vsyncadd (%p298_p1), %s203_s12, 4294967264  ;;  %s17_s11 = sadd.s32 1, %s465_s11   ;;  %s607_s6 = smov %s449_s7 }
  0x39   : > { %p14_p2 = scmp.ge.s32.totalorder %s17_s11, 4   ;;  %s608_s7 = smov %s453_s8 }
  0x3a   : > { %s609_s8 = smov %s536_s20  ;;  %s610_s9 = smov %s461_s10 }
  0x3b   : > { %s611_s10 = smov %s613_s14  ;;  %16 = sbr.rel (!%p14_p2) target bundleno = 6 (0x6), region = 69 }
  0x40   :  { %209 = vsyncpa [#allocation3], 1 }
  0x41   :  { %211 = vsyncpa [#allocation3 + $0x1], 1 }
  0x42   :  { %212 = vsyncpa [#allocation4], 1 }
  0x43   :  { %214 = vsyncpa [#allocation4 + $0x1], 1 }

</bundles_post_ra>
